<compile_context>
chip_gen: v7x
topology: tpu7x:2x2x1
jax: 0.10.0
libtpu: 0.0.40
codegen_flags: <defaults>
</compile_context>

<pallas_src>
import jax
import jax.numpy as jnp
from jax.experimental import pallas as pl
from jax.experimental.pallas import tpu as pltpu


def _identity_dma_kernel(x_hbm, o_hbm, sem):
    # Single direct HBM -> HBM DMA of the whole array.  Skips the
    # HBM->VMEM->vreg->VMEM->HBM round trip of a tiled copy entirely.
    cp = pltpu.make_async_copy(x_hbm, o_hbm, sem)
    cp.start()
    cp.wait()


def layer_forward(x, *, materialize=True):
    """Pallas equivalent of Layer.forward(inputs) -> inputs.

    materialize=False: return the input unchanged (zero HBM traffic, the
                       recommended path for an identity op).
    materialize=True : produce a fresh output buffer via one HBM->HBM DMA
                       (exercises the Pallas kernel; bit-exact identity).
    """
    if not materialize:
        return x

    return pl.pallas_call(
        _identity_dma_kernel,
        out_shape=jax.ShapeDtypeStruct(x.shape, x.dtype),
        # Leave both operands in HBM; the kernel drives the DMA itself, so
        # there are no block-shape / (8,128) constraints and no grid.
        in_specs=[pl.BlockSpec(memory_space=pl.ANY)],
        out_specs=pl.BlockSpec(memory_space=pl.ANY),
        scratch_shapes=[pltpu.SemaphoreType.DMA],
        compiler_params=pltpu.CompilerParams(has_side_effects=True),
    )(x)


class PallasLayer:
    """Mirror of the PyTorch base `Layer`: no parameters, identity _call."""

    _LAYER_UIDS = {}

    @classmethod
    def _get_layer_uid(cls, layer_name=""):
        if layer_name not in cls._LAYER_UIDS:
            cls._LAYER_UIDS[layer_name] = 1
            return 1
        cls._LAYER_UIDS[layer_name] += 1
        return cls._LAYER_UIDS[layer_name]

    def __init__(self, name=None, logging=False):
        if not name:
            layer = self.__class__.__name__.lower()
            name = layer + "_" + str(self._get_layer_uid(layer))
        self.name = name
        self.vars = {}          # base Layer defines no parameters
        self.logging = logging
        self.sparse_inputs = False
        # TODO(synk): TF-style histogram logging has no Pallas equivalent; skipped (does not affect outputs).

    def _call(self, inputs):
        return layer_forward(inputs)

    def __call__(self, inputs):
        return self._call(inputs)


if __name__ == "__main__":
    key = jax.random.PRNGKey(0)
    # Small GCN-ish node-feature matrix: 16 nodes x 256 features.
    x = jax.random.normal(key, (16, 256), dtype=jnp.float32)

    layer = PallasLayer()
    out = layer(x)
    out = jax.block_until_ready(out)

    assert out.shape == x.shape and out.dtype == x.dtype
    assert bool(jnp.array_equal(out, x))

    # Zero-cost path (recommended for production use of an identity layer).
    out2 = layer_forward(x, materialize=False)
    assert out2 is x

    print("KERNEL_OK")
</pallas_src>

<mosaic_0001>
module attributes {stable_mosaic.version = 11 : i64} {
  func.func @_identity_dma_kernel(%arg0: memref<16x256xf32, #tpu.memory_space<any>>, %arg1: memref<16x256xf32, #tpu.memory_space<any>>, %arg2: memref<!tpu.dma_semaphore, #tpu.memory_space<semaphore_mem>>) attributes {dimension_semantics = [], scalar_prefetch = 0 : i64, scratch_operands = 1 : i64, tpu.core_type = #tpu.core_type<tc>} {
    tpu.enqueue_dma source(%arg0 : memref<16x256xf32, #tpu.memory_space<any>>) target(%arg1 : memref<16x256xf32, #tpu.memory_space<any>>) target_semaphore(%arg2 : memref<!tpu.dma_semaphore, #tpu.memory_space<semaphore_mem>>)
    tpu.wait_dma2 semaphore(%arg2 : memref<!tpu.dma_semaphore, #tpu.memory_space<semaphore_mem>>) src(%arg0 : memref<16x256xf32, #tpu.memory_space<any>>) dst(%arg1 : memref<16x256xf32, #tpu.memory_space<any>>)
    return
  }
}

</mosaic_0001>

<bundles_post_ra>
// kernel: tpu_custom_call.1
= control target key start
LH: loop header
LB: loop body
LE: loop exit
PB: predicated region body
PF: predicated region fallthrough
CT: control target
= control target key end

     0   :  { %s35_s6 = smov [#allocation2]   ;;  %s36_s7 = smov [#allocation3]   ;;  %s54_s0 = inlined_call_operand.hbm [shape: f32[16,256], index: 0, kind: input, shape index: {}]   ;;  %s55_s1 = inlined_call_operand.hbm [shape: f32[16,256], index: 1, kind: output, shape index: {}]  }
   0x1   :  { %s37_s8 = smov 0  }
   0x2   :  { %18 = dma.general %s54_s0, 512, %s55_s1, %s35_s6, %s36_s7, [#allocation4], %s37_s8, 0  }
   0x3   :  { %33 = dma.done.wait [#allocation2], 512 }
   0x4   :  { %34 = vsyncadd [#allocation2], 4294966784 }
   0x5   :  { %23 = vsyncmov [#allocation2] }
   0x8   :  { %s24_s13 = vpop.sfrf %23 }
   0x9   :  { %p29_p0 = scmp.ne.s32.totalorder %s24_s13, 0 }
   0xb   :  { %28 = shalt.err (%p29_p0)  }

</bundles_post_ra>
